<compile_context>
chip_gen: v6e
topology: v6e:2x2x1
jax: 0.10.0
libtpu: 0.0.40
codegen_flags: <defaults>
</compile_context>

<pallas_src>
import functools

import jax
import jax.numpy as jnp
from jax import lax
from jax.experimental import pallas as pl
from jax.experimental.pallas import tpu as pltpu


# Per-image parameter record (int32), flattened to 1-D over the batch:
#   [apply, (y1, y2, x1, x2, full, ys) * n_holes]
def _param_stride(n_holes):
    return 1 + 6 * n_holes


# -----------------------------------------------------------------------------
# Path 1: small images — whole-image, auto-pipelined, lane-dense masked select.
# -----------------------------------------------------------------------------
def _cutout_dense_kernel(params_ref, img_ref, out_ref, *, n_holes, stride, W):
    b = pl.program_id(0)
    base_b = b * stride
    x = img_ref[...]                       # (1, C, H*W): lane-dense last dim
    hw = x.shape[-1]

    idx = lax.broadcasted_iota(jnp.int32, (1, 1, hw), 2)
    if W & (W - 1) == 0:                   # static: power-of-two width
        row = jnp.right_shift(idx, W.bit_length() - 1)
        col = jnp.bitwise_and(idx, W - 1)
    else:
        row = idx // W
        col = idx - row * W

    in_hole = jnp.zeros((1, 1, hw), dtype=jnp.bool_)
    for h in range(n_holes):               # n_holes is a small static int
        base = base_b + 1 + 6 * h
        y1 = params_ref[base + 0]
        y2 = params_ref[base + 1]
        x1 = params_ref[base + 2]
        x2 = params_ref[base + 3]
        in_hole |= (row >= y1) & (row < y2) & (col >= x1) & (col < x2)

    in_hole &= params_ref[base_b] == 1     # fold the probability gate in
    out_ref[...] = jnp.where(in_hole, jnp.zeros_like(x), x)


@functools.partial(jax.jit, static_argnames=("n_holes",))
def cutout_pallas_dense(imgs, params, *, n_holes):
    """imgs: (B,C,H,W).  params: 1-D int32, length B*(1+6*n_holes)."""
    B, C, H, W = imgs.shape
    stride = _param_stride(n_holes)
    x = imgs.reshape(B, C, H * W)          # free view; lane-dense last dim
    kernel = functools.partial(_cutout_dense_kernel, n_holes=n_holes,
                               stride=stride, W=W)
    itemsize = jnp.dtype(imgs.dtype).itemsize
    out = pl.pallas_call(
        kernel,
        out_shape=jax.ShapeDtypeStruct((B, C, H * W), imgs.dtype),
        grid_spec=pltpu.PrefetchScalarGridSpec(
            num_scalar_prefetch=1,
            grid=(B,),
            in_specs=[pl.BlockSpec((1, C, H * W), lambda b, p_ref: (b, 0, 0))],
            out_specs=pl.BlockSpec((1, C, H * W), lambda b, p_ref: (b, 0, 0)),
        ),
        compiler_params=pltpu.CompilerParams(
            dimension_semantics=("parallel",)),
        cost_estimate=pl.CostEstimate(
            flops=B * C * H * W, transcendentals=0,
            bytes_accessed=int(2 * B * C * H * W * itemsize)),
    )(params, x)
    return out.reshape(B, C, H, W)


# -----------------------------------------------------------------------------
# Path 2: large images — in-place, gated, window-only manual DMA.
# -----------------------------------------------------------------------------
def _cutout_window_kernel(params_ref, img_hbm, out_hbm, zero_ref, win_ref,
                          sem_ref, *, n_holes, stride, fh, fw, W):
    """params_ref: 1-D SMEM int32, layout [apply,(y1,y2,x1,x2,full,ys)*n]*B.
       img_hbm / out_hbm: full (B,C,H,W) HBM refs (aliased buffers).
       zero_ref: VMEM (C,fh,fw) zeros source for write-only hole fills.
       win_ref : VMEM (C,fh,W) full-width row window for clipped holes.
       sem_ref : DMA semaphores, shape (2,)."""
    del img_hbm                        # aliased with out_hbm; RMW through out
    b = pl.program_id(0)
    base_b = b * stride

    @pl.when(params_ref[base_b] == 1)  # gate: passthrough images cost 0 DMA
    def _apply():
        # Zero the write-only source whenever it may be used (scratch is
        # uninitialised, and with dimension_semantics=("parallel",) a
        # program_id==0 one-shot init would never run on the second core).
        zero_ref[...] = jnp.zeros_like(zero_ref)
        # Hoisted iotas (JAX does not CSE broadcast_in_dim across holes).
        row = lax.broadcasted_iota(jnp.int32, (fh, W), 0)
        col = lax.broadcasted_iota(jnp.int32, (fh, W), 1)

        for h in range(n_holes):        # n_holes is a small static int
            base = base_b + 1 + 6 * h
            y1 = params_ref[base + 0]
            y2 = params_ref[base + 1]
            x1 = params_ref[base + 2]
            x2 = params_ref[base + 3]
            full = params_ref[base + 4]  # hole is exactly (fh,fw): unclipped
            ys = params_ref[base + 5]    # clamped row-window start

            @pl.when(full == 1)
            def _zero_fill():            # write-only: 1 DMA, no read, no mask
                cp = pltpu.make_async_copy(
                    zero_ref,
                    out_hbm.at[b, :, pl.ds(y1, fh), pl.ds(x1, fw)],
                    sem_ref.at[0])
                cp.start()
                cp.wait()

            @pl.when(full == 0)
            def _rmw():                  # border-clipped hole: RMW full rows
                window = out_hbm.at[b, :, pl.ds(ys, fh), :]
                cp_in = pltpu.make_async_copy(window, win_ref, sem_ref.at[1])
                cp_in.start()
                # Mask is built while the inbound DMA is in flight.
                in_hole = ((row >= y1 - ys) & (row < y2 - ys)
                           & (col >= x1) & (col < x2))
                cp_in.wait()
                win = win_ref[...]
                win_ref[...] = jnp.where(in_hole[None], jnp.zeros_like(win),
                                         win)
                cp_out = pltpu.make_async_copy(win_ref, window, sem_ref.at[1])
                cp_out.start()
                # The write-back wait stays inline: deferring it across grid
                # steps needs per-core pending-DMA bookkeeping (and overlap
                # hazards with later holes); the write-only zero path above
                # already removes the extra DMA latency for the common
                # (unclipped) case.
                cp_out.wait()


@functools.partial(jax.jit, static_argnames=("n_holes", "length"),
                   donate_argnums=(0,))
def cutout_pallas_windowed(imgs, params, *, n_holes, length):
    """imgs: (B,C,H,W) — DONATED (in-place, like torch).  params: 1-D int32."""
    B, C, H, W = imgs.shape
    fh = min(2 * (length // 2), H)      # max (clipped) hole height
    fw = min(2 * (length // 2), W)      # max (clipped) hole width
    if fh == 0 or fw == 0:              # length < 2: holes are empty slices
        return imgs
    stride = _param_stride(n_holes)
    kernel = functools.partial(_cutout_window_kernel, n_holes=n_holes,
                               stride=stride, fh=fh, fw=fw, W=W)
    itemsize = jnp.dtype(imgs.dtype).itemsize
    # TODO(synk): for very large B, group several images per grid step (inner
    #             fori_loop over SMEM params) to amortize the ~0.35us/step
    #             overhead on passthrough-heavy batches (review item #5).
    return pl.pallas_call(
        kernel,
        out_shape=jax.ShapeDtypeStruct((B, C, H, W), imgs.dtype),
        grid_spec=pltpu.PrefetchScalarGridSpec(
            num_scalar_prefetch=1,
            grid=(B,),
            in_specs=[pl.BlockSpec(memory_space=pl.ANY)],   # raw HBM, manual DMA
            out_specs=pl.BlockSpec(memory_space=pl.ANY),
            scratch_shapes=[
                pltpu.VMEM((C, fh, fw), imgs.dtype),        # zeros source
                pltpu.VMEM((C, fh, W), imgs.dtype),         # row window
                pltpu.SemaphoreType.DMA((2,)),
            ],
        ),
        # Operand indices include the scalar-prefetch arg: 0=params, 1=imgs.
        input_output_aliases={1: 0},
        compiler_params=pltpu.CompilerParams(
            dimension_semantics=("parallel",),
            has_side_effects=True,   # all writes are manual DMAs under pl.when
        ),
        cost_estimate=pl.CostEstimate(
            flops=0, transcendentals=0,
            bytes_accessed=int(B * n_holes * 2 * C * fh * W * itemsize)),
    )(params, imgs)


_DENSE_MAX_IMAGE_BYTES = 256 * 1024     # per-image slab easily VMEM-resident


def cutout_pallas(imgs, params, *, n_holes, length):
    """Size-based dispatch.  NOTE: the windowed path donates `imgs`."""
    _, C, H, W = imgs.shape
    if C * H * W * jnp.dtype(imgs.dtype).itemsize <= _DENSE_MAX_IMAGE_BYTES:
        return cutout_pallas_dense(imgs, params, n_holes=n_holes)
    return cutout_pallas_windowed(imgs, params, n_holes=n_holes, length=length)


# -----------------------------------------------------------------------------
# Host-side RNG glue (mirrors torch.rand gate + random.randint centers).
# -----------------------------------------------------------------------------
def make_cutout_params(key, img_hw, *, n_holes, length, p):
    """Per-image int32 record: [apply, (y1, y2, x1, x2, full, ys) * n_holes].

    full = hole is exactly (fh, fw), i.e. unclipped -> write-only zero fill.
    ys   = clamp(y1, 0, H - fh): row start of the fixed-height RMW window.
    """
    H, W = img_hw
    fh = min(2 * (length // 2), H)
    fw = min(2 * (length // 2), W)
    key_gate, key = jax.random.split(key)
    # torch: `if torch.rand(1).item() > p: return img`  =>  apply iff rand <= p
    parts = [(jax.random.uniform(key_gate) <= p).astype(jnp.int32)]
    for _ in range(n_holes):
        key, ky, kx = jax.random.split(key, 3)
        y = jax.random.randint(ky, (), 0, H)    # random.randint(0, H-1) incl.
        x = jax.random.randint(kx, (), 0, W)
        y1 = jnp.maximum(0, y - length // 2)
        y2 = jnp.minimum(H, y + length // 2)
        x1 = jnp.maximum(0, x - length // 2)
        x2 = jnp.minimum(W, x + length // 2)
        full = ((y2 - y1 == fh) & (x2 - x1 == fw)).astype(jnp.int32)
        ys = jnp.clip(y1, 0, H - fh)
        parts += [y1, y2, x1, x2, full, ys]
    return jnp.stack([jnp.asarray(v, jnp.int32) for v in parts])


def cutout_reference(imgs, params_2d, *, n_holes):
    """Pure-JAX reference with identical semantics (params_2d: (B, 1+6n))."""
    _, _, H, W = imgs.shape
    rows = jnp.arange(H)[None, None, :, None]
    cols = jnp.arange(W)[None, None, None, :]
    apply_b = (params_2d[:, 0] == 1)[:, None, None, None]
    out = imgs
    for h in range(n_holes):
        base = 1 + 6 * h
        y1 = params_2d[:, base + 0][:, None, None, None]
        y2 = params_2d[:, base + 1][:, None, None, None]
        x1 = params_2d[:, base + 2][:, None, None, None]
        x2 = params_2d[:, base + 3][:, None, None, None]
        hole = (rows >= y1) & (rows < y2) & (cols >= x1) & (cols < x2)
        out = jnp.where(apply_b & hole, jnp.zeros_like(out), out)
    return out


if __name__ == "__main__":
    # Module defaults: n_holes=1, length=16, p=0.5 (no learned parameters).
    n_holes, length, p = 1, 16, 0.5
    B, C, H, W = 4, 3, 32, 32       # CIFAR-style images, small batch

    key = jax.random.PRNGKey(0)
    key_img, key_rng = jax.random.split(key)
    imgs = jax.random.normal(key_img, (B, C, H, W), dtype=jnp.float32)

    keys = jax.random.split(key_rng, B)
    params_2d = jax.vmap(
        functools.partial(make_cutout_params, img_hw=(H, W),
                          n_holes=n_holes, length=length, p=p))(keys)
    params = params_2d.reshape(-1)   # 1-D int32 -> no SMEM (x,128) padding

    # Reference, fully materialised BEFORE the windowed call donates `imgs`.
    ref = jax.block_until_ready(
        cutout_reference(imgs, params_2d, n_holes=n_holes))

    # Path 1: dense whole-image kernel (dispatcher picks it at this size).
    out_dense = cutout_pallas(imgs, params, n_holes=n_holes, length=length)
    out_dense = jax.block_until_ready(out_dense)
    assert out_dense.shape == ref.shape and out_dense.dtype == ref.dtype
    assert bool(jnp.array_equal(out_dense, ref)), "dense path mismatch"

    # Path 2: windowed in-place kernel (used for large images), exercised here
    # too.  `imgs` is donated and must not be used afterwards.
    out_win = cutout_pallas_windowed(imgs, params, n_holes=n_holes,
                                     length=length)
    out_win = jax.block_until_ready(out_win)
    assert out_win.shape == ref.shape and out_win.dtype == ref.dtype
    assert bool(jnp.array_equal(out_win, ref)), "windowed path mismatch"

    print("KERNEL_OK")
</pallas_src>

<mosaic_0001>
module attributes {stable_mosaic.version = 11 : i64} {
  func.func @_cutout_dense_kernel(%arg0: i32, %arg1: memref<28xi32, #tpu.memory_space<smem>>, %arg2: memref<1x3x1024xf32, #tpu.memory_space<vmem>>, %arg3: memref<1x3x1024xf32, #tpu.memory_space<vmem>>) attributes {dimension_semantics = [#tpu.dimension_semantics<parallel>], iteration_bounds = array<i64: 4>, scalar_prefetch = 1 : i64, scratch_operands = 0 : i64, tpu.core_type = #tpu.core_type<tc>, window_params = [{transform_indices = @transform_0, window_bounds = array<i64: 1, 3, 1024>}, {transform_indices = @transform_1, window_bounds = array<i64: 1, 3, 1024>}]} {
    %c7_i32 = arith.constant 7 : i32
    %0 = arith.muli %arg0, %c7_i32 : i32
    %c0 = arith.constant 0 : index
    %c0_0 = arith.constant 0 : index
    %c0_1 = arith.constant 0 : index
    %1 = vector.load %arg2[%c0, %c0_0, %c0_1] : memref<1x3x1024xf32, #tpu.memory_space<vmem>>, vector<1x3x1024xf32>
    %2 = tpu.iota {dimensions = array<i32: 2>} : vector<1x1x1024xi32>
    %c5_i32 = arith.constant 5 : i32
    %3 = vector.broadcast %c5_i32 : i32 to vector<1x1x1024xi32>
    %4 = arith.shrsi %2, %3 : vector<1x1x1024xi32>
    %c31_i32 = arith.constant 31 : i32
    %5 = vector.broadcast %c31_i32 : i32 to vector<1x1x1024xi32>
    %6 = arith.andi %2, %5 : vector<1x1x1024xi32>
    %false = arith.constant false
    %7 = vector.broadcast %false : i1 to vector<1x1x1024xi1>
    %c1_i32 = arith.constant 1 : i32
    %8 = arith.addi %0, %c1_i32 : i32
    %c0_i32 = arith.constant 0 : i32
    %9 = arith.addi %8, %c0_i32 : i32
    %c0_i32_2 = arith.constant 0 : i32
    %10 = arith.addi %9, %c0_i32_2 : i32
    %11 = arith.index_cast %10 : i32 to index
    %12 = memref.load %arg1[%11] : memref<28xi32, #tpu.memory_space<smem>>
    %c1_i32_3 = arith.constant 1 : i32
    %13 = arith.addi %9, %c1_i32_3 : i32
    %14 = arith.index_cast %13 : i32 to index
    %15 = memref.load %arg1[%14] : memref<28xi32, #tpu.memory_space<smem>>
    %c2_i32 = arith.constant 2 : i32
    %16 = arith.addi %9, %c2_i32 : i32
    %17 = arith.index_cast %16 : i32 to index
    %18 = memref.load %arg1[%17] : memref<28xi32, #tpu.memory_space<smem>>
    %c3_i32 = arith.constant 3 : i32
    %19 = arith.addi %9, %c3_i32 : i32
    %20 = arith.index_cast %19 : i32 to index
    %21 = memref.load %arg1[%20] : memref<28xi32, #tpu.memory_space<smem>>
    %22 = vector.broadcast %12 : i32 to vector<1x1x1024xi32>
    %23 = arith.cmpi sge, %4, %22 : vector<1x1x1024xi32>
    %24 = vector.broadcast %15 : i32 to vector<1x1x1024xi32>
    %25 = arith.cmpi slt, %4, %24 : vector<1x1x1024xi32>
    %26 = arith.andi %23, %25 : vector<1x1x1024xi1>
    %27 = vector.broadcast %18 : i32 to vector<1x1x1024xi32>
    %28 = arith.cmpi sge, %6, %27 : vector<1x1x1024xi32>
    %29 = arith.andi %26, %28 : vector<1x1x1024xi1>
    %30 = vector.broadcast %21 : i32 to vector<1x1x1024xi32>
    %31 = arith.cmpi slt, %6, %30 : vector<1x1x1024xi32>
    %32 = arith.andi %29, %31 : vector<1x1x1024xi1>
    %33 = arith.ori %7, %32 : vector<1x1x1024xi1>
    %34 = arith.index_cast %0 : i32 to index
    %35 = memref.load %arg1[%34] : memref<28xi32, #tpu.memory_space<smem>>
    %c1_i32_4 = arith.constant 1 : i32
    %36 = arith.cmpi eq, %35, %c1_i32_4 : i32
    %37 = vector.broadcast %36 : i1 to vector<1x1x1024xi1>
    %38 = arith.andi %33, %37 : vector<1x1x1024xi1>
    %cst = arith.constant 0.000000e+00 : f32
    %39 = vector.broadcast %cst : f32 to vector<1x3x1024xf32>
    %40 = vector.shape_cast %38 : vector<1x1x1024xi1> to vector<1x1x1024xi1>
    %41 = vector.broadcast %40 : vector<1x1x1024xi1> to vector<1x3x1024xi1>
    %42 = arith.select %41, %39, %1 : vector<1x3x1024xi1>, vector<1x3x1024xf32>
    %c0_5 = arith.constant 0 : index
    %c0_6 = arith.constant 0 : index
    %c0_7 = arith.constant 0 : index
    %43 = vector.load %arg3[%c0_5, %c0_6, %c0_7] : memref<1x3x1024xf32, #tpu.memory_space<vmem>>, vector<1x3x1024xf32>
    tpu.vector_store %arg3[%c0_5, %c0_6, %c0_7], %42 {strides = array<i32>} : memref<1x3x1024xf32, #tpu.memory_space<vmem>>, vector<1x3x1024xf32>,
    return
  }
  func.func @transform_0(%arg0: i32, %arg1: memref<28xi32, #tpu.memory_space<smem>>) -> (i32, i32, i32) {
    %c0_i32 = arith.constant 0 : i32
    %c0_i32_0 = arith.constant 0 : i32
    %c0_i32_1 = arith.constant 0 : i32
    return %arg0, %c0_i32, %c0_i32_0 : i32, i32, i32
  }
  func.func @transform_1(%arg0: i32, %arg1: memref<28xi32, #tpu.memory_space<smem>>) -> (i32, i32, i32) {
    %c0_i32 = arith.constant 0 : i32
    %c0_i32_0 = arith.constant 0 : i32
    %c0_i32_1 = arith.constant 0 : i32
    return %arg0, %c0_i32, %c0_i32_0 : i32, i32, i32
  }
}

</mosaic_0001>

<bundles_post_ra>
// kernel: cutout_pallas_dense.1
= control target key start
LH: loop header
LB: loop body
LE: loop exit
PB: predicated region body
PF: predicated region fallthrough
CT: control target
= control target key end

     0   :  { %s685_s0 = inlined_call_operand.vmem [shape: s32[28], index: 0, kind: input, shape index: {}]   ;;  %s686_s1 = inlined_call_operand.vmem [shape: f32[4,3,1024], index: 1, kind: input, shape index: {}]   ;;  %s687_s2 = inlined_call_operand.vmem [shape: f32[4,3,1024], index: 2, kind: output, shape index: {}]  }
   0x1   :  { %s7_s11 = sshll.u32 %s685_s0, 4  ;;  %s8_s11 = int_to_ptr.vmem [resolvable:$true] %s7_s11 }
   0x2   :  { %s373_s12 = scalar_lea.vmem %s8_s11, 16  ;;  %p378_p1 = scmp.lt.s32.totalorder %s8_s11, %s8_s11 }
   0x3   :  { %p374_p0 = scmp.ne.s32.totalorder %s8_s11, %s373_s12  ;;  %p379_p2 = scmp.lt.s32.totalorder %s373_s12, %s373_s12 }
   0x5   :  { %p380_p3 = por %p379_p2, %p378_p1 }
   0x7   :  { %p381_p4 = pnand %p380_p3, %p374_p0 }
   0x9   :  { %384 = shalt.err (!%p381_p4)  }
   0xa   :  { %s395_s13 = smov [#allocation3]  }
   0xb   :  { %10 = dma.vmem_to_smem %s8_s11, 16, %s395_s13, [#allocation2] }
   0xc   :  { %389 = dma.done.wait [#allocation2], 16 }
   0xd   :  { %390 = vsyncadd [#allocation2], 4294967280 }
   0xe   :  { %12 = sfence }
   0xf   :  { %s415_s14 = smov 0  }
  0x10 LB: > { %s346_s0 = sadd.s32 4294967295, %s393_s14   ;;  %p350_p5 = scmp.ge.s32.totalorder %s393_s14, 1  ;;  %s393_s14 = sphi %s415_s14, %s18_s14  }
  0x11   : > { %p94_p6 = scmp.lt.s32.totalorder %s393_s14, 5 }
  0x13   : > { %p95_p7 = pnand %p350_p5, %p94_p6 }
  0x14   : > { %s124_s15 = smul.u32 (!%p95_p7), 7, %s346_s0  ;;  %p114_p8 = scmp.lt.s32.totalorder (!%p95_p7), %s346_s0, 3 }
  0x15   : > { %98 = sbr.rel (%p95_p7) target bundleno = 71 (0x47), region = 24 }
  0x16   : > { %s154_s16 = sadd.s32 (!%p95_p7), 1, %s124_s15  ;;  %s156_s17 = sadd.s32 (!%p95_p7), 2, %s124_s15 }
  0x17   : > { %s155_s18 = sld [smem:[#allocation3 + %s154_s16]] (!%p95_p7)  ;;  %s158_s20 = sadd.s32 (!%p95_p7), 3, %s124_s15 }
  0x18   : > { %s157_s19 = sld [smem:[#allocation3 + %s156_s17]] (!%p95_p7)  ;;  %s160_s22 = sadd.s32 (!%p95_p7), 4, %s124_s15 }
  0x19   : > { %s159_s21 = sld [smem:[#allocation3 + %s158_s20]] (!%p95_p7) }
  0x1a   : > { %v129_v0 = vlaneseq  ;;  %s741_s0 = smov (!%p114_p8, %s346_s0), 3  ;;  %s161_s23 = sld [smem:[#allocation3 + %s160_s22]]  ;;  %v396_v34 = vmov 0  }
  0x1b   : > { %s222_s24 = sld [smem:[#allocation3 + %s124_s15]]  ;;  %s357_s25 = sshll.u32 %s741_s0, 5 }
  0x1c   : > { %v423_v1 = vand.u32 127, %v129_v0  ;;  %s466_s28 = scalar_lea.vmem %s686_s1, %s357_s25  ;;  %s565_s4 = scalar_lea.vmem %s687_s2, %s357_s25 }
  0x1d   : > { %v431_v8 = vstv %s155_s18  ;;  %v125_v25 = vld [vmem:[%s466_s28] sm:$0x77]  ;;  %v126_v44 = vld [vmem:[%s466_s28 + $0x8] sm:$0x77] }
  0x1e   : > { %v131_v2 = vadd.s32 128, %v423_v1  ;;  %v138_v3 = vshra.s32 %v423_v1, 5  ;;  %v132_v5 = vadd.s32 256, %v423_v1  ;;  %v146_v6 = vand.u32 31, %v423_v1 }
  0x1f   : > { %v444_v11 = vstv %s157_s19  ;;  %v133_v12 = vadd.s32 384, %v423_v1  ;;  %v453_v14 = vstv %s159_s21  ;;  %v134_v28 = vadd.s32 512, %v423_v1 }
  0x20   : > { %v139_v4 = vshra.s32 %v131_v2, 5  ;;  %v147_v7 = vand.u32 31, %v131_v2  ;;  %vm434_vm0 = vcmp.ge.s32.totalorder %v138_v3, %v431_v8  ;;  %vm172_vm2 = vcmp.lt.s32.totalorder %v138_v3, %v444_v11 }
  0x21   : > { %v140_v15 = vshra.s32 %v132_v5, 5  ;;  %vm180_vm4 = vmand %vm434_vm0, %vm172_vm2  ;;  %vm189_vm5 = vcmp.ge.s32.totalorder %v146_v6, %v453_v14  ;;  %v459_v16 = vstv %s161_s23  ;;  %p223_p9 = scmp.eq.s32.totalorder %s222_s24, 1  ;;  %v141_v20 = vshra.s32 %v133_v12, 5 }
  0x22   : > { %vm440_vm1 = vcmp.ge.s32.totalorder %v139_v4, %v431_v8  ;;  %vm449_vm3 = vcmp.lt.s32.totalorder %v139_v4, %v444_v11  ;;  %vm190_vm6 = vcmp.ge.s32.totalorder %v147_v7, %v453_v14  ;;  %vm473_vm8 = vcmp.lt.s32.totalorder %v146_v6, %v459_v16  ;;  %vm477_vm9 = vmand %vm180_vm4, %vm189_vm5 }
  0x23   : > { %vm181_vm7 = vmand %vm440_vm1, %vm449_vm3  ;;  %vm482_vm10 = vcmp.lt.s32.totalorder %v147_v7, %v459_v16  ;;  %s224_s29 = scalar_select %p223_p9, 1, 0  ;;  %v148_v22 = vand.u32 31, %v132_v5  ;;  %vm491_vm12 = vcmp.ge.s32.totalorder %v140_v15, %v431_v8  ;;  %vm496_vm13 = vcmp.lt.s32.totalorder %v140_v15, %v444_v11  ;;  %v128_v15 = vld [vmem:[%s466_s28 + $0x18] sm:$0x77] }
  0x24   : > { %vm486_vm11 = vmand %vm181_vm7, %vm190_vm6  ;;  %v149_v26 = vand.u32 31, %v133_v12  ;;  %vm515_vm1 = vcmp.ge.s32.totalorder %v141_v20, %v431_v8  ;;  %vm520_vm2 = vcmp.lt.s32.totalorder %v141_v20, %v444_v11  ;;  %v135_v32 = vadd.s32 640, %v423_v1 }
  0x25   : > { %vm214_vm14 = vmand %vm477_vm9, %vm473_vm8  ;;  %v225_v27 = vstv %s224_s29  ;;  %v255_v33 = vcombine.high %v125_v25, %v125_v25  ;;  %vm191_vm5 = vcmp.ge.s32.totalorder %v148_v22, %v453_v14  ;;  %v142_v38 = vshra.s32 %v134_v28, 5 }
  0x26   : > { %vm215_vm15 = vmand %vm486_vm11, %vm482_vm10  ;;  %vm510_vm0 = vcmp.eq.s32.totalorder %v225_v27, 1  ;;  %vm192_vm7 = vcmp.ge.s32.totalorder %v149_v26, %v453_v14  ;;  %vm542_vm10 = vcmp.lt.s32.totalorder %v148_v22, %v459_v16  ;;  %v143_v42 = vshra.s32 %v135_v32, 5 }
  0x27   : > { %vm182_vm3 = vmand %vm491_vm12, %vm496_vm13  ;;  %v150_v46 = vand.u32 31, %v134_v28  ;;  %v151_v48 = vand.u32 31, %v135_v32  ;;  %v136_v51 = vadd.s32 768, %v423_v1  ;;  %v256_v52 = vcombine.high %v126_v44, %v126_v44 }
  0x28   : > { %vm227_vm4 = vmand %vm214_vm14, %vm510_vm0  ;;  %v137_v55 = vadd.s32 896, %v423_v1  ;;  %v127_v1 = vld [vmem:[%s466_s28 + $0x10] sm:$0x77] }
  0x29   : > { %vm228_vm6 = vmand %vm215_vm15, %vm510_vm0  ;;  %v235_v35 = vsel %vm227_vm4, 1, %v396_v34  ;;  %vm556_vm15 = vcmp.lt.s32.totalorder %v149_v26, %v459_v16  ;;  %v144_v60 = vshra.s32 %v136_v51, 5  ;;  %v152_v2 = vand.u32 31, %v136_v51 }
  0x2a   : > { %v236_v36 = vsel %vm228_vm6, 1, %v396_v34  ;;  %vm243_vm8 = vcmp.eq.s32.totalorder %v235_v35, 1  ;;  %vm183_vm9 = vmand %vm515_vm1, %vm520_vm2  ;;  %vm581_vm2 = vcmp.ge.s32.totalorder %v142_v38, %v431_v8  ;;  %vm600_vm6 = vcmp.lt.s32.totalorder %v143_v42, %v444_v11 }
  0x2b   : > { %vm244_vm11 = vcmp.eq.s32.totalorder %v236_v36, 1  ;;  %v263_v39 = vsel %vm243_vm8, 0.0, %v125_v25  ;;  %vm551_vm14 = vmand %vm182_vm3, %vm191_vm5  ;;  %vm586_vm3 = vcmp.lt.s32.totalorder %v142_v38, %v444_v11  ;;  %vm595_vm5 = vcmp.ge.s32.totalorder %v143_v42, %v431_v8 }
  0x2c   : > { %v264_v43 = vsel %vm244_vm11, 0.0, %v255_v33  ;;  %vm568_vm12 = vmand %vm183_vm9, %vm192_vm7  ;;  %vm193_vm8 = vcmp.ge.s32.totalorder %v150_v46, %v453_v14  ;;  %vm194_vm11 = vcmp.ge.s32.totalorder %v151_v48, %v453_v14  ;;  %v145_v63 = vshra.s32 %v137_v55, 5 }
  0x2d   : > { %v279_v47 = vcombine.low %v263_v39, %v264_v43  ;;  %vm216_vm13 = vmand %vm551_vm14, %vm542_vm10  ;;  %v153_v3 = vand.u32 31, %v137_v55  ;;  %v257_v6 = vcombine.high %v127_v1, %v127_v1 }
  0x2e   : > { %vm217_vm1 = vmand %vm568_vm12, %vm556_vm15  ;;  %vm620_vm12 = vcmp.lt.s32.totalorder %v150_v46, %v459_v16 }
  0x2f   : > { %287 = vst [vmem:[%s565_s4] sm:$0x77] %v279_v47  ;;  %vm229_vm4 = vmand %vm216_vm13, %vm510_vm0 }
  0x30   : > { %vm230_vm7 = vmand %vm217_vm1, %vm510_vm0  ;;  %v237_v56 = vsel %vm229_vm4, 1, %v396_v34  ;;  %vm625_vm1 = vcmp.lt.s32.totalorder %v151_v48, %v459_v16 }
  0x31   : > { %v238_v57 = vsel %vm230_vm7, 1, %v396_v34  ;;  %vm245_vm9 = vcmp.eq.s32.totalorder %v237_v56, 1  ;;  %vm184_vm10 = vmand %vm581_vm2, %vm586_vm3 }
  0x32   : > { %vm246_vm14 = vcmp.eq.s32.totalorder %v238_v57, 1  ;;  %v265_v58 = vsel %vm245_vm9, 0.0, %v126_v44  ;;  %vm185_vm15 = vmand %vm595_vm5, %vm600_vm6  ;;  %vm636_vm5 = vcmp.ge.s32.totalorder %v144_v60, %v431_v8  ;;  %vm641_vm6 = vcmp.lt.s32.totalorder %v144_v60, %v444_v11 }
  0x33   : > { %v266_v61 = vsel %vm246_vm14, 0.0, %v256_v52  ;;  %vm201_vm13 = vmand %vm184_vm10, %vm193_vm8  ;;  %vm648_vm8 = vcmp.ge.s32.totalorder %v145_v63, %v431_v8  ;;  %vm653_vm9 = vcmp.lt.s32.totalorder %v145_v63, %v444_v11 }
  0x34   : > { %v280_v0 = vcombine.low %v265_v58, %v266_v61  ;;  %vm202_vm2 = vmand %vm185_vm15, %vm194_vm11  ;;  %vm195_vm11 = vcmp.ge.s32.totalorder %v152_v2, %v453_v14 }
  0x35   : > { %vm218_vm3 = vmand %vm201_vm13, %vm620_vm12  ;;  %vm196_vm12 = vcmp.ge.s32.totalorder %v153_v3, %v453_v14  ;;  %v258_v14 = vcombine.high %v128_v15, %v128_v15 }
  0x36   : > { %288 = vst [vmem:[%s565_s4 + $0x8] sm:$0x77] %v280_v0  ;;  %vm219_vm4 = vmand %vm202_vm2, %vm625_vm1  ;;  %vm212_vm2 = vcmp.lt.s32.totalorder %v152_v2, %v459_v16 }
  0x37   : > { %vm231_vm7 = vmand %vm218_vm3, %vm510_vm0 }
  0x38   : > { %vm232_vm10 = vmand %vm219_vm4, %vm510_vm0  ;;  %v239_v10 = vsel %vm231_vm7, 1, %v396_v34  ;;  %vm213_vm4 = vcmp.lt.s32.totalorder %v153_v3, %v459_v16 }
  0x39   : > { %v240_v12 = vsel %vm232_vm10, 1, %v396_v34  ;;  %vm247_vm14 = vcmp.eq.s32.totalorder %v239_v10, 1  ;;  %vm186_vm15 = vmand %vm636_vm5, %vm641_vm6 }
  0x3a   : > { %vm248_vm13 = vcmp.eq.s32.totalorder %v240_v12, 1  ;;  %v267_v8 = vsel %vm247_vm14, 0.0, %v127_v1  ;;  %vm187_vm1 = vmand %vm648_vm8, %vm653_vm9 }
  0x3b   : > { %v268_v11 = vsel %vm248_vm13, 0.0, %v257_v6  ;;  %vm203_vm3 = vmand %vm186_vm15, %vm195_vm11 }
  0x3c   : > { %v281_v13 = vcombine.low %v267_v8, %v268_v11  ;;  %vm204_vm7 = vmand %vm187_vm1, %vm196_vm12 }
  0x3d   : > { %vm220_vm5 = vmand %vm203_vm3, %vm212_vm2 }
  0x3e   : > { %289 = vst [vmem:[%s565_s4 + $0x10] sm:$0x77] %v281_v13  ;;  %vm221_vm6 = vmand %vm204_vm7, %vm213_vm4 }
  0x3f   : > { %vm233_vm10 = vmand %vm220_vm5, %vm510_vm0 }
  0x40   : > { %vm234_vm8 = vmand %vm221_vm6, %vm510_vm0  ;;  %v241_v17 = vsel %vm233_vm10, 1, %v396_v34 }
  0x41   : > { %v242_v18 = vsel %vm234_vm8, 1, %v396_v34  ;;  %vm249_vm9 = vcmp.eq.s32.totalorder %v241_v17, 1 }
  0x42   : > { %vm250_vm11 = vcmp.eq.s32.totalorder %v242_v18, 1  ;;  %v269_v16 = vsel %vm249_vm9, 0.0, %v128_v15 }
  0x43   : > { %v270_v19 = vsel %vm250_vm11, 0.0, %v258_v14 }
  0x44   : > { %v282_v20 = vcombine.low %v269_v16, %v270_v19 }
  0x46   : > { %290 = vst [vmem:[%s565_s4 + $0x18] sm:$0x77] %v282_v20 }
  0x47 PF: > { %s18_s14 = sadd.s32 1, %s393_s14  }
  0x48   : > { %p15_p10 = scmp.ge.s32.totalorder %s18_s14, 6  }
  0x4a   :  { %17 = sbr.rel (!%p15_p10) target bundleno = 16 (0x10), region = 54 }

</bundles_post_ra>
